<compile_context>
chip_gen: v6e
topology: v6e:2x2x1
jax: 0.10.0
libtpu: 0.0.40
codegen_flags: <defaults>
</compile_context>

<pallas_src>
import numpy as np
import jax
import jax.numpy as jnp
from jax.experimental import pallas as pl
from jax.experimental.pallas import tpu as pltpu


# ----------------------------------------------------------------------------
# pe table (matches the PyTorch __init__)
# ----------------------------------------------------------------------------
def _build_pe(d_model: int, max_len: int = 5000, dtype=jnp.float32) -> jnp.ndarray:
    """Positional-encoding table, matching the PyTorch __init__ exactly.

    NOTE: the reference module literally uses np.log10(10000.0) (== 4.0), not
    ln(10000); reproduced verbatim so numerics match the spec.
    """
    position = np.arange(0, max_len, dtype=np.float32)[:, None]               # (max_len, 1)
    div_term = np.exp(
        np.arange(0, d_model, 2, dtype=np.float32) * (-np.log10(10000.0) / d_model)
    )                                                                         # (ceil(d/2),)
    pe = np.zeros((max_len, d_model), dtype=np.float32)
    pe[:, 0::2] = np.sin(position * div_term)
    pe[:, 1::2] = np.cos(position * div_term[: d_model // 2])                 # odd-d_model safe
    return jnp.asarray(pe, dtype=dtype)                                       # (max_len, d_model)


# ----------------------------------------------------------------------------
# kernel
# ----------------------------------------------------------------------------
def _pe_add_kernel(x_ref, pe_ref, o_ref):
    # x_ref / o_ref: (1, TR, TN) blocks; pe_ref: (1, TN) or (TR, TN).
    # Pure VPU broadcast-add: no cross-lane work, no in-kernel copies.
    o_ref[...] = x_ref[...] + pe_ref[...]


# ----------------------------------------------------------------------------
# tiling helpers
# ----------------------------------------------------------------------------
def _cdiv(a: int, b: int) -> int:
    return -(-a // b)


def _sublane_tile(dtype) -> int:
    # Native second-minor tile: 8 rows (4-byte), 16 (2-byte), 32 (1-byte).
    return max(8, 32 // jnp.dtype(dtype).itemsize)


def _smallest_aligned_divisor(S: int, D: int):
    """Smallest divisor d of S with (d*D) % 128 == 0, or None if none exists."""
    for d in range(1, S + 1):
        if S % d == 0 and (d * D) % 128 == 0:
            return d
    return None


def _vmem_budget_and_limit():
    """(tiling budget, compiler vmem_limit_bytes), generation aware & consistent."""
    vmem_bytes = 64 * 1024 * 1024  # conservative default (v7x per-TC physical VMEM)
    try:
        info = pltpu.get_tpu_info()
        vmem_bytes = int(getattr(info, "vmem_capacity_bytes", vmem_bytes)) or vmem_bytes
    except Exception:
        pass
    limit = min(32 * 1024 * 1024, vmem_bytes // 2)       # 32 MiB everywhere today
    budget = min(20 * 1024 * 1024, (3 * limit) // 4)     # leave headroom under the limit
    return budget, limit


def _pick_tiles(R: int, Nf: int, pe_rows: int, dtype, budget_bytes: int):
    """Row/lane tiles for a (B_outer, R, Nf) view with a (pe_rows, Nf) pe table.

    The footprint model rounds the sublane dim up to the dtype sublane tile and
    the lane dim up to 128 (Mosaic pads every VMEM block to native tiles).
    """
    item = jnp.dtype(dtype).itemsize
    sub = _sublane_tile(dtype)

    def pad_r(r):
        return _cdiv(r, sub) * sub

    def pad_n(n):
        return _cdiv(n, 128) * 128

    def footprint(tr, tn):
        pr = 1 if pe_rows == 1 else tr
        # double-buffered x + out + pe blocks, padded to native tiles
        return 2 * (2 * pad_r(tr) + pad_r(pr)) * pad_n(tn) * item

    # Row tile: whole row axis when modest, else a multiple of the sublane tile.
    tr = R if R <= 256 else 256

    # Lane tile: multiple of 128, sized so each padded x block is ~2 MiB
    # (the measured HBM-roofline plateau for elementwise adds).
    target_block = 2 * 1024 * 1024
    cap = max(128, (target_block // max(1, pad_r(tr) * item)) // 128 * 128)

    if Nf % 128 == 0:
        tn = min(Nf, cap)
    elif footprint(tr, Nf) <= budget_bytes:
        tn = Nf                                           # full-extent lane block
    else:
        tn = min(cap, max(128, (Nf // 128) * 128))        # tile in 128s; masked tail

    # Shrink until the double-buffered footprint fits the budget.
    while footprint(tr, tn) > budget_bytes and tn > 128:
        tn = max(128, (tn // 2) // 128 * 128)
    while footprint(tr, tn) > budget_bytes and tr > sub:
        tr = max(sub, pad_r(tr // 2))

    return tr, tn


# ----------------------------------------------------------------------------
# forward
# ----------------------------------------------------------------------------
def positional_encoding_forward(x: jnp.ndarray, pe: jnp.ndarray, *,
                                min_pallas_bytes: int = 1 << 20) -> jnp.ndarray:
    """x: (B, S, D); pe: (max_len, D).  Returns x + pe[:S] broadcast over batch."""
    if x.ndim != 3:
        raise ValueError(f"expected x of shape (batch, seq, d_model); got {x.shape}")
    B, S, D = x.shape
    if S > pe.shape[0]:
        raise ValueError(f"sequence length {S} exceeds pe max_len {pe.shape[0]}")
    if D != pe.shape[1]:
        raise ValueError(f"d_model mismatch: x has {D}, pe has {pe.shape[1]}")

    itemsize = jnp.dtype(x.dtype).itemsize
    pe_s = pe[:S, :].astype(x.dtype)   # no-op cast if pe was pre-cast at init

    # Tiny-input fast path: the fixed pallas_call/pipeline prologue dominates
    # below ~1 MiB and XLA's fused add is already at roofline.
    if B * S * D * itemsize < min_pallas_bytes:
        return x + pe_s[None]

    sub = _sublane_tile(x.dtype)
    N = S * D

    # Pick the flattened view (see module docstring).
    s_inner = _smallest_aligned_divisor(S, D)
    use_seq_major = (B < sub) and (s_inner is not None) and (S // s_inner > B)

    if use_seq_major:
        s_outer = S // s_inner
        R, Nf, Rp = s_outer, s_inner * D, s_outer
        x_view = x.reshape(B, R, Nf)
        pe_view = pe_s.reshape(R, Nf)
        n_batch = B
    else:
        R, Nf, Rp = B, N, 1
        x_view = x.reshape(1, B, N)
        pe_view = pe_s.reshape(1, N)
        n_batch = 1

    budget, vmem_limit = _vmem_budget_and_limit()
    tr, tn = _pick_tiles(R, Nf, Rp, x.dtype, budget)

    g_r = _cdiv(R, tr)
    g_n = _cdiv(Nf, tn)
    pe_block_rows = tr if Rp > 1 else 1

    # Grid: axis with the most blocks leads (v7x megacore sharding); batch is
    # innermost so the pe block index is constant between consecutive steps and
    # the pipeline skips re-DMAing it.
    if g_r >= g_n:
        grid = (g_r, g_n, n_batch)
        x_map = lambda r, n, b: (b, r, n)
        pe_map = (lambda r, n, b: (r, n)) if Rp > 1 else (lambda r, n, b: (0, n))
    else:
        grid = (g_n, g_r, n_batch)
        x_map = lambda n, r, b: (b, r, n)
        pe_map = (lambda n, r, b: (r, n)) if Rp > 1 else (lambda n, r, b: (0, n))

    out_view = pl.pallas_call(
        _pe_add_kernel,
        out_shape=jax.ShapeDtypeStruct(x_view.shape, x.dtype),
        grid_spec=pltpu.PrefetchScalarGridSpec(
            num_scalar_prefetch=0,
            grid=grid,
            in_specs=[
                pl.BlockSpec((1, tr, tn), x_map),              # x tile
                pl.BlockSpec((pe_block_rows, tn), pe_map),     # pe tile (grid-broadcast)
            ],
            out_specs=pl.BlockSpec((1, tr, tn), x_map),
        ),
        compiler_params=pltpu.CompilerParams(
            dimension_semantics=("parallel", "parallel", "parallel"),
            vmem_limit_bytes=vmem_limit,
        ),
        cost_estimate=pl.CostEstimate(
            flops=B * S * D,
            bytes_accessed=(2 * B * S * D + S * D) * itemsize,
            transcendentals=0,
        ),
    )(x_view, pe_view)

    return out_view.reshape(B, S, D)


class PositionalEncoding:
    """JAX/Pallas port of the PyTorch PositionalEncoding module.

    The pe buffer is built once at init (register_buffer style) and pre-cast to
    the activation dtype, so the hot path never re-materializes or re-casts it.
    """

    def __init__(self, d_model: int, max_len: int = 5000, dtype=jnp.float32):
        self.d_model = d_model
        self.max_len = max_len
        self.pe = _build_pe(d_model, max_len, dtype)   # (max_len, d_model)

    def __call__(self, x: jnp.ndarray, *, min_pallas_bytes: int = 1 << 20) -> jnp.ndarray:
        return positional_encoding_forward(x, self.pe, min_pallas_bytes=min_pallas_bytes)


if __name__ == "__main__":
    B, S, D = 2, 8, 32
    MAX_LEN = 64

    key = jax.random.PRNGKey(0)
    x = jax.random.normal(key, (B, S, D), dtype=jnp.float32)

    module = PositionalEncoding(D, max_len=MAX_LEN, dtype=jnp.float32)

    # Force the Pallas path at this tiny smoke-test size (the default
    # min_pallas_bytes would route it to the plain-XLA fast path).
    out = module(x, min_pallas_bytes=0)
    out = jax.block_until_ready(out)

    # sanity check against plain-JAX reference
    ref = x + module.pe[None, :S, :]
    assert out.shape == (B, S, D)
    np.testing.assert_allclose(np.asarray(out), np.asarray(ref), rtol=1e-6, atol=1e-6)

    print("KERNEL_OK")
</pallas_src>

<mosaic_0001>
module attributes {stable_mosaic.version = 11 : i64} {
  func.func @_pe_add_kernel(%arg0: i32, %arg1: i32, %arg2: i32, %arg3: memref<1x2x256xf32, #tpu.memory_space<vmem>>, %arg4: memref<1x256xf32, #tpu.memory_space<vmem>>, %arg5: memref<1x2x256xf32, #tpu.memory_space<vmem>>) attributes {dimension_semantics = [#tpu.dimension_semantics<parallel>, #tpu.dimension_semantics<parallel>, #tpu.dimension_semantics<parallel>], iteration_bounds = array<i64: 1, 1, 1>, scalar_prefetch = 0 : i64, scratch_operands = 0 : i64, tpu.core_type = #tpu.core_type<tc>, window_params = [{transform_indices = @transform_0, window_bounds = array<i64: 1, 2, 256>}, {transform_indices = @transform_1, window_bounds = array<i64: 1, 256>}, {transform_indices = @transform_2, window_bounds = array<i64: 1, 2, 256>}]} {
    %c0 = arith.constant 0 : index
    %c0_0 = arith.constant 0 : index
    %c0_1 = arith.constant 0 : index
    %0 = vector.load %arg3[%c0, %c0_0, %c0_1] : memref<1x2x256xf32, #tpu.memory_space<vmem>>, vector<1x2x256xf32>
    %c0_2 = arith.constant 0 : index
    %c0_3 = arith.constant 0 : index
    %1 = vector.load %arg4[%c0_2, %c0_3] : memref<1x256xf32, #tpu.memory_space<vmem>>, vector<1x256xf32>
    %2 = vector.shape_cast %1 : vector<1x256xf32> to vector<1x1x256xf32>
    %3 = vector.broadcast %2 : vector<1x1x256xf32> to vector<1x2x256xf32>
    %4 = arith.addf %0, %3 : vector<1x2x256xf32>
    %c0_4 = arith.constant 0 : index
    %c0_5 = arith.constant 0 : index
    %c0_6 = arith.constant 0 : index
    %5 = vector.load %arg5[%c0_4, %c0_5, %c0_6] : memref<1x2x256xf32, #tpu.memory_space<vmem>>, vector<1x2x256xf32>
    tpu.vector_store %arg5[%c0_4, %c0_5, %c0_6], %4 {strides = array<i32>} : memref<1x2x256xf32, #tpu.memory_space<vmem>>, vector<1x2x256xf32>,
    return
  }
  func.func @transform_0(%arg0: i32, %arg1: i32, %arg2: i32) -> (i32, i32, i32) {
    %c0_i32 = arith.constant 0 : i32
    return %arg2, %arg0, %arg1 : i32, i32, i32
  }
  func.func @transform_1(%arg0: i32, %arg1: i32, %arg2: i32) -> (i32, i32) {
    %c0_i32 = arith.constant 0 : i32
    %c0_i32_0 = arith.constant 0 : i32
    return %c0_i32, %arg1 : i32, i32
  }
  func.func @transform_2(%arg0: i32, %arg1: i32, %arg2: i32) -> (i32, i32, i32) {
    %c0_i32 = arith.constant 0 : i32
    return %arg2, %arg0, %arg1 : i32, i32, i32
  }
}

</mosaic_0001>

<bundles_post_ra>
// kernel: tpu_custom_call.1
= control target key start
LH: loop header
LB: loop body
LE: loop exit
PB: predicated region body
PF: predicated region fallthrough
CT: control target
= control target key end

     0   :  { %7 = vsyncpa [#allocation3], 0  ;;  %s172_s0 = inlined_call_operand.hbm [shape: f32[1,2,256], index: 0, kind: input, shape index: {}]   ;;  %s173_s1 = inlined_call_operand.hbm [shape: f32[1,256], index: 1, kind: input, shape index: {}]   ;;  %s174_s2 = inlined_call_operand.hbm [shape: f32[1,2,256], index: 2, kind: output, shape index: {}]  }
   0x1   :  { %8 = vsyncpa [#allocation6], 0 }
   0x2   :  { %9 = vsyncpa [#allocation4], 0  ;;  %s144_s9 = smov [#allocation2]   ;;  %s145_s11 = smov [#allocation5]  }
   0x3   :  { %s16_s10 = sshll.u32 %s144_s9, 4  ;;  %s26_s12 = sshll.u32 %s145_s11, 4  ;;  %s17_s10 = int_to_ptr.vmem [resolvable:$true] %s16_s10  ;;  %s27_s12 = int_to_ptr.vmem [resolvable:$true] %s26_s12 }
   0x4   :  { %s86_s13 = scalar_lea.vmem %s17_s10, 64  ;;  %p91_p1 = scmp.lt.s32.totalorder %s17_s10, %s17_s10 }
   0x5   :  { %p87_p0 = scmp.ne.s32.totalorder %s17_s10, %s86_s13  ;;  %p92_p2 = scmp.lt.s32.totalorder %s86_s13, %s86_s13 }
   0x7   :  { %p93_p3 = por %p92_p2, %p91_p1 }
   0x9   :  { %p94_p4 = pnand %p93_p3, %p87_p0 }
   0xb   :  { %97 = shalt.err (!%p94_p4)
}
   0xc   :  { %19 = dma.hbm_to_vmem [thread:$0]  %s172_s0, 64, %s17_s10, [#allocation3]  }
   0xd   :  { %s106_s16 = scalar_lea.vmem %s27_s12, 32  ;;  %p111_p6 = scmp.lt.s32.totalorder %s27_s12, %s27_s12 }
   0xe   :  { %p107_p5 = scmp.ne.s32.totalorder %s27_s12, %s106_s16  ;;  %p112_p7 = scmp.lt.s32.totalorder %s106_s16, %s106_s16 }
  0x10   :  { %p113_p8 = por %p112_p7, %p111_p6 }
  0x12   :  { %p114_p9 = pnand %p113_p8, %p107_p5 }
  0x14   :  { %117 = shalt.err (!%p114_p9)
}
  0x15   :  { %29 = dma.hbm_to_vmem [thread:$0]  %s173_s1, 32, %s27_s12, [#allocation6]  }
  0x16   :  { %138 = dma.done.wait [#allocation3], 64  }
  0x17   :  { %139 = vsyncadd [#allocation3], 4294967232 }
  0x18   :  { %140 = dma.done.wait [#allocation6], 32  }
  0x19   :  { %141 = vsyncadd [#allocation6], 4294967264  ;;  %v39_v0 = vlaneseq  ;;  %v146_v1 = vmov 1983009808   ;;  %v37_v7 = vld [vmem:[#allocation5] sm:$0x3] }
  0x1a   :  { %v49_v2 = vunpack.c.l.s4 %v146_v1  ;;  %v36_v12 = vld [vmem:[#allocation2] sm:$0xf]  ;;  %s147_s0 = smov [#allocation7]  }
  0x1b   :  { %v40_v3 = vshrl.u32 %v39_v0, 7  ;;  %s64_s19 = sshll.u32 %s147_s0, 4  ;;  %s65_s19 = int_to_ptr.vmem [resolvable:$true] %s64_s19 }
  0x1c   :  { %v50_v6 = vunpack.c.0.s8 %v49_v2  ;;  %s118_s1 = scalar_lea.vmem %s65_s19, 64  ;;  %p123_p11 = scmp.lt.s32.totalorder %s65_s19, %s65_s19 }
  0x1d   :  { %v41_v4 = vsub.s32 0, %v40_v3  ;;  %v45_v5 = vsub.s32 1, %v40_v3  ;;  %p119_p10 = scmp.ne.s32.totalorder %s65_s19, %s118_s1  ;;  %p124_p12 = scmp.lt.s32.totalorder %s118_s1, %s118_s1 }
  0x1e   :  { %v53_v10 = vsub.s32 %v50_v6, %v40_v3 }
  0x1f   :  { %v42_v8 = vrot.slane %v37_v7, %v41_v4  ;;  %v46_v9 = vrot.slane %v37_v7, %v45_v5  ;;  %p125_p13 = por %p124_p12, %p123_p11 }
  0x21   :  { %v47_v11 = vcombine.low %v42_v8, %v46_v9  ;;  %p126_p0 = pnand %p125_p13, %p119_p10 }
  0x23   :  { %v54_v13 = vrot.slane %v47_v11, %v53_v10 }
  0x25   :  { %v56_v14 = vadd.f32 %v54_v13, %v36_v12 }
  0x27   :  { %57 = vst [vmem:[#allocation7] sm:$0xf] %v56_v14 }
  0x28   :  { %129 = shalt.err (!%p126_p0)
}
  0x29   :  { %67 = dma.vmem_to_hbm [thread:$0]  %s65_s19, 64, %s174_s2, [#allocation4]  }
  0x2a   :  { %142 = dma.done.wait [#allocation4], 64  }
  0x2b   :  { %143 = vsyncadd [#allocation4], 4294967232 }
  0x2c   :  { %71 = vsyncpa [#allocation3], 1 }
  0x2d   :  { %72 = vsyncpa [#allocation6], 1 }
  0x2e   :  { %73 = vsyncpa [#allocation4], 1 }

</bundles_post_ra>
